<compile_context>
chip_gen: v5e
topology: v5e:2x2
jax: 0.10.0
libtpu: 0.0.40
codegen_flags: <defaults>
</compile_context>

<pallas_src>
import math

import jax
import jax.numpy as jnp
from jax import lax
from jax.experimental import pallas as pl
from jax.experimental.pallas import tpu as pltpu

# ---------------- small, TPU-friendly config ----------------
B, S, H = 2, 8, 32        # batch, seq len, bert hidden_size
BS = B * S                # 16 flattened (batch*seq) rows
FFN = 64                  # encoder feed-forward dim (synthetic stand-in BERT)
GRU_H = 32                # gru_hidden_size
NUM_CLS = 4               # num_classes
VOCAB = 64
LN_EPS = 1e-12            # BERT LayerNorm eps
PANEL = 128               # lane-panel width for fused QKV / GRU-input projections
SLAB_W = 3 * PANEL        # 384-lane parameter slab
OUT_PAD = 128             # lane-dense logits width (fc weights zero-padded)

# ---------------- parameter-slab row layout ----------------
R_TOK = 0                       # 64 rows : token embedding (VOCAB, H)        lanes [0:H)
R_POS = R_TOK + VOCAB           # 16 rows : position embedding tiled (BS, H)  lanes [0:H)
R_WQKV = R_POS + BS             # 32 rows : fused QKV weight, panels @ 0/128/256
R_WO = R_WQKV + H               # 32 rows : attention output proj (H, H)
R_W1 = R_WO + H                 # 32 rows : FFN in (H, FFN)
R_W2 = R_W1 + H                 # 64 rows : FFN out (FFN, H)
R_WIH = R_W2 + FFN              # 32 rows : fused GRU input weight, panels @ 0/128/256
R_FCW = R_WIH + H               # 32 rows : fc weight (GRU_H, OUT_PAD)
R_BIAS = R_FCW + GRU_H          # 16 rows : bias / LayerNorm rows (13 used)
SLAB_ROWS = R_BIAS + 16         # 320 rows total (multiple of 8)


def _layernorm(x, g, b):
    mu = jnp.mean(x, axis=-1, keepdims=True)
    var = jnp.mean(jnp.square(x - mu), axis=-1, keepdims=True)
    return (x - mu) * jax.lax.rsqrt(var + LN_EPS) * g + b


# ------- single fused kernel: embed -> BERT layer -> CLS -> GRU step -> FC -------
def fused_kernel(ids_ref, abias_ref, w_ref, o_ref):
    # -- static row/lane views of the packed parameter slab (free slicing) --
    tok = w_ref[R_TOK:R_TOK + VOCAB, :H]
    pos = w_ref[R_POS:R_POS + BS, :H]
    wqkv = w_ref[R_WQKV:R_WQKV + H, :]            # (H, 384), q|k|v panels
    wo = w_ref[R_WO:R_WO + H, :H]
    w1 = w_ref[R_W1:R_W1 + H, :FFN]
    w2 = w_ref[R_W2:R_W2 + FFN, :H]
    wih = w_ref[R_WIH:R_WIH + H, :]               # (H, 384), r|z|n panels
    fcw = w_ref[R_FCW:R_FCW + GRU_H, :OUT_PAD]    # (GRU_H, 128), cols>=NUM_CLS zero

    rb = R_BIAS
    bqkv = w_ref[rb + 0:rb + 1, :]                # (1, 384), bq pre-scaled by 1/sqrt(H)
    bo = w_ref[rb + 1:rb + 2, :H]
    ln1g = w_ref[rb + 2:rb + 3, :H]
    ln1b = w_ref[rb + 3:rb + 4, :H]
    b1 = w_ref[rb + 4:rb + 5, :FFN]
    b2 = w_ref[rb + 5:rb + 6, :H]
    ln2g = w_ref[rb + 6:rb + 7, :H]
    ln2b = w_ref[rb + 7:rb + 8, :H]
    b_r = w_ref[rb + 8:rb + 9, :GRU_H]            # b_ih_r + b_hh_r (pre-summed)
    b_z = w_ref[rb + 9:rb + 10, :GRU_H]           # b_ih_z + b_hh_z (pre-summed)
    b_in = w_ref[rb + 10:rb + 11, :GRU_H]         # b_ih_n
    b_hn = w_ref[rb + 11:rb + 12, :GRU_H]         # b_hh_n (multiplied by r)
    fcb = w_ref[rb + 12:rb + 13, :OUT_PAD]        # fc bias, zero-padded to 128 lanes

    # -- embedding lookup: one-hot matmul over all B*S rows (no gather) --
    ids = ids_ref[...]                                                  # (BS, 1) int32
    onehot = (lax.broadcasted_iota(jnp.int32, (BS, VOCAB), 1) == ids
              ).astype(jnp.float32)                                     # (BS, VOCAB)
    x = jnp.dot(onehot, tok, preferred_element_type=jnp.float32) + pos  # (BS, H)

    # -- self-attention: one fused QKV matmul, scale folded into wq/bq --
    qkv = jnp.dot(x, wqkv, preferred_element_type=jnp.float32) + bqkv   # (BS, 384)
    q = qkv[:, 0:H]                         # lane offset 0   (vreg-aligned)
    k = qkv[:, PANEL:PANEL + H]             # lane offset 128 (vreg-aligned)
    v = qkv[:, 2 * PANEL:2 * PANEL + H]     # lane offset 256 (vreg-aligned)

    scores = lax.dot_general(q, k, (((1,), (1,)), ((), ())),
                             preferred_element_type=jnp.float32)        # (BS, BS), NT
    scores = scores + abias_ref[...]        # block-diagonal + key-padding additive mask
    scores = scores - jnp.max(scores, axis=-1, keepdims=True)           # stable softmax
    p = jnp.exp(scores)
    p = p * pl.reciprocal(jnp.sum(p, axis=-1, keepdims=True), approx=True)

    attn = jnp.dot(p, v, preferred_element_type=jnp.float32)            # (BS, H)
    attn = jnp.dot(attn, wo, preferred_element_type=jnp.float32) + bo
    x1 = _layernorm(x + attn, ln1g, ln1b)

    # -- feed-forward --
    hdn = jax.nn.gelu(jnp.dot(x1, w1, preferred_element_type=jnp.float32) + b1)
    ff = jnp.dot(hdn, w2, preferred_element_type=jnp.float32) + b2
    x2 = _layernorm(x1 + ff, ln2g, ln2b)                                 # (BS, H)

    # -- GRU single step from h_0 = 0 (PyTorch gate order r,z,n); dead h-terms removed.
    #    Computed on all BS rows (trivial); host keeps only the CLS rows 0 and S. --
    g = jnp.dot(x2, wih, preferred_element_type=jnp.float32)             # (BS, 384)
    r = jax.nn.sigmoid(g[:, 0:GRU_H] + b_r)
    z = jax.nn.sigmoid(g[:, PANEL:PANEL + GRU_H] + b_z)
    n = jnp.tanh(g[:, 2 * PANEL:2 * PANEL + GRU_H] + b_in + r * b_hn)
    h = (1.0 - z) * n                                                    # + z*h0 == 0
    # nn.Dropout(0.5): identity in inference mode.
    # Lane-dense, full-tile (16,128) store (fc weights/bias zero-padded to 128 lanes).
    o_ref[...] = jnp.dot(h, fcw, preferred_element_type=jnp.float32) + fcb


def bert_gru_forward(input_ids, attention_mask, param_slab):
    # Input formatting kept outside the kernel (fused into the surrounding jit).
    ids_col = input_ids.reshape(BS, 1).astype(jnp.int32)                 # (BS, 1)
    batch_of = jnp.arange(BS, dtype=jnp.int32) // S
    same = (batch_of[:, None] == batch_of[None, :]).astype(jnp.float32)  # block-diagonal
    mask_flat = attention_mask.astype(jnp.float32).reshape(BS)
    attn_bias = (same * mask_flat[None, :] - 1.0) * 1e9                  # (BS, BS) additive

    out = pl.pallas_call(
        fused_kernel,
        out_shape=jax.ShapeDtypeStruct((BS, OUT_PAD), jnp.float32),
        in_specs=[pl.BlockSpec(memory_space=pltpu.MemorySpace.VMEM)] * 3,
        out_specs=pl.BlockSpec(memory_space=pltpu.MemorySpace.VMEM),
    )(ids_col, attn_bias, param_slab)
    # Rows 0 and S are the per-batch CLS rows; slice the padded logit lanes.
    return out[::S, :NUM_CLS]


bert_gru_forward_jit = jax.jit(bert_gru_forward)


# ---------------- deterministic parameter init (PyTorch-like raw params) ----------------
def init_params(key):
    ks = iter(jax.random.split(key, 32))
    nrm = lambda shape, s=0.02: s * jax.random.normal(next(ks), shape, jnp.float32)
    ones = lambda shape: jnp.ones(shape, jnp.float32)
    zeros = lambda shape: jnp.zeros(shape, jnp.float32)
    p = {}
    # synthetic BERT
    p["tok_emb"] = nrm((VOCAB, H))
    p["pos_emb"] = nrm((S, H))
    p["wq"], p["bq"] = nrm((H, H)), zeros((1, H))
    p["wk"], p["bk"] = nrm((H, H)), zeros((1, H))
    p["wv"], p["bv"] = nrm((H, H)), zeros((1, H))
    p["wo"], p["bo"] = nrm((H, H)), zeros((1, H))
    p["ln1_g"], p["ln1_b"] = ones((1, H)), zeros((1, H))
    p["w1"], p["b1"] = nrm((H, FFN)), zeros((1, FFN))
    p["w2"], p["b2"] = nrm((FFN, H)), zeros((1, H))
    p["ln2_g"], p["ln2_b"] = ones((1, H)), zeros((1, H))
    # GRU: PyTorch weight_ih_l0 is (3*GRU_H, H) in gate order (r,z,n); stored here
    # transposed and stacked per gate -> (3, H, GRU_H).
    bound = 1.0 / math.sqrt(GRU_H)
    unif = lambda shape: jax.random.uniform(next(ks), shape, jnp.float32, -bound, bound)
    p["w_ih"] = unif((3, H, GRU_H))
    p["w_hh"] = unif((3, GRU_H, GRU_H))   # unused at runtime: h0 == 0 (kept for fidelity)
    p["b_ih"] = unif((3, 1, GRU_H))
    p["b_hh"] = unif((3, 1, GRU_H))
    # fc: nn.Linear(GRU_H, NUM_CLS)
    p["fc_w"] = unif((GRU_H, NUM_CLS))
    p["fc_b"] = unif((1, NUM_CLS))
    return p


# ----- one-time host-side fusion: pack EVERY parameter into one (320, 384) f32 slab -----
def prepare_fused_params(p):
    scale = 1.0 / math.sqrt(H)
    slab = jnp.zeros((SLAB_ROWS, SLAB_W), jnp.float32)

    def put(s, r, c, mat):
        mat = jnp.asarray(mat, jnp.float32)
        return s.at[r:r + mat.shape[0], c:c + mat.shape[1]].set(mat)

    slab = put(slab, R_TOK, 0, p["tok_emb"])
    slab = put(slab, R_POS, 0, jnp.tile(p["pos_emb"], (B, 1)))      # pos tiled over batch
    slab = put(slab, R_WQKV, 0 * PANEL, p["wq"] * scale)            # 1/sqrt(H) folded in
    slab = put(slab, R_WQKV, 1 * PANEL, p["wk"])
    slab = put(slab, R_WQKV, 2 * PANEL, p["wv"])
    slab = put(slab, R_WO, 0, p["wo"])
    slab = put(slab, R_W1, 0, p["w1"])
    slab = put(slab, R_W2, 0, p["w2"])
    slab = put(slab, R_WIH, 0 * PANEL, p["w_ih"][0])
    slab = put(slab, R_WIH, 1 * PANEL, p["w_ih"][1])
    slab = put(slab, R_WIH, 2 * PANEL, p["w_ih"][2])
    slab = put(slab, R_FCW, 0, p["fc_w"])                           # zero-padded to 128 lanes

    rb = R_BIAS
    slab = put(slab, rb + 0, 0 * PANEL, p["bq"] * scale)
    slab = put(slab, rb + 0, 1 * PANEL, p["bk"])
    slab = put(slab, rb + 0, 2 * PANEL, p["bv"])
    slab = put(slab, rb + 1, 0, p["bo"])
    slab = put(slab, rb + 2, 0, p["ln1_g"])
    slab = put(slab, rb + 3, 0, p["ln1_b"])
    slab = put(slab, rb + 4, 0, p["b1"])
    slab = put(slab, rb + 5, 0, p["b2"])
    slab = put(slab, rb + 6, 0, p["ln2_g"])
    slab = put(slab, rb + 7, 0, p["ln2_b"])
    slab = put(slab, rb + 8, 0, p["b_ih"][0] + p["b_hh"][0])        # r-gate bias (pre-summed)
    slab = put(slab, rb + 9, 0, p["b_ih"][1] + p["b_hh"][1])        # z-gate bias (pre-summed)
    slab = put(slab, rb + 10, 0, p["b_ih"][2])                      # n-gate input bias
    slab = put(slab, rb + 11, 0, p["b_hh"][2])                      # n-gate hidden bias (*r)
    slab = put(slab, rb + 12, 0, p["fc_b"])                         # fc bias (padded lanes)
    return slab


if __name__ == "__main__":
    key = jax.random.PRNGKey(0)
    pkey, ikey = jax.random.split(key)
    params = init_params(pkey)
    param_slab = prepare_fused_params(params)

    # x = {"input_ids": ..., "attention_mask": ...}
    input_ids = jax.random.randint(ikey, (B, S), 0, VOCAB)
    attention_mask = jnp.ones((B, S), jnp.float32).at[1, 6:].set(0.0)

    # Fully fused forward: embeddings -> encoder -> CLS -> GRU(1 step) -> dropout(eval) -> fc
    logits = bert_gru_forward_jit(input_ids, attention_mask, param_slab)
    jax.block_until_ready(logits)

    assert logits.shape == (B, NUM_CLS) and logits.dtype == jnp.float32
    assert bool(jnp.all(jnp.isfinite(logits)))
    print("KERNEL_OK")
</pallas_src>

<mosaic_0001>
module attributes {stable_mosaic.version = 11 : i64} {
  func.func @fused_kernel(%arg0: memref<16x1xi32, #tpu.memory_space<vmem>>, %arg1: memref<16x16xf32, #tpu.memory_space<vmem>>, %arg2: memref<320x384xf32, #tpu.memory_space<vmem>>, %arg3: memref<16x128xf32, #tpu.memory_space<vmem>>) attributes {dimension_semantics = [], scalar_prefetch = 0 : i64, scratch_operands = 0 : i64, tpu.core_type = #tpu.core_type<tc>} {
    %c0 = arith.constant 0 : index
    %c0_0 = arith.constant 0 : index
    %0 = vector.load %arg2[%c0, %c0_0] : memref<320x384xf32, #tpu.memory_space<vmem>>, vector<64x32xf32>
    %c64 = arith.constant 64 : index
    %c0_1 = arith.constant 0 : index
    %1 = vector.load %arg2[%c64, %c0_1] : memref<320x384xf32, #tpu.memory_space<vmem>>, vector<16x32xf32>
    %c80 = arith.constant 80 : index
    %c0_2 = arith.constant 0 : index
    %2 = vector.load %arg2[%c80, %c0_2] : memref<320x384xf32, #tpu.memory_space<vmem>>, vector<32x384xf32>
    %c112 = arith.constant 112 : index
    %c0_3 = arith.constant 0 : index
    %3 = vector.load %arg2[%c112, %c0_3] : memref<320x384xf32, #tpu.memory_space<vmem>>, vector<32x32xf32>
    %c144 = arith.constant 144 : index
    %c0_4 = arith.constant 0 : index
    %4 = vector.load %arg2[%c144, %c0_4] : memref<320x384xf32, #tpu.memory_space<vmem>>, vector<32x64xf32>
    %c176 = arith.constant 176 : index
    %c0_5 = arith.constant 0 : index
    %5 = vector.load %arg2[%c176, %c0_5] : memref<320x384xf32, #tpu.memory_space<vmem>>, vector<64x32xf32>
    %c240 = arith.constant 240 : index
    %c0_6 = arith.constant 0 : index
    %6 = vector.load %arg2[%c240, %c0_6] : memref<320x384xf32, #tpu.memory_space<vmem>>, vector<32x384xf32>
    %c272 = arith.constant 272 : index
    %c0_7 = arith.constant 0 : index
    %7 = vector.load %arg2[%c272, %c0_7] : memref<320x384xf32, #tpu.memory_space<vmem>>, vector<32x128xf32>
    %c304 = arith.constant 304 : index
    %c0_8 = arith.constant 0 : index
    %8 = vector.load %arg2[%c304, %c0_8] : memref<320x384xf32, #tpu.memory_space<vmem>>, vector<1x384xf32>
    %c305 = arith.constant 305 : index
    %c0_9 = arith.constant 0 : index
    %9 = vector.load %arg2[%c305, %c0_9] : memref<320x384xf32, #tpu.memory_space<vmem>>, vector<1x32xf32>
    %c306 = arith.constant 306 : index
    %c0_10 = arith.constant 0 : index
    %10 = vector.load %arg2[%c306, %c0_10] : memref<320x384xf32, #tpu.memory_space<vmem>>, vector<1x32xf32>
    %c307 = arith.constant 307 : index
    %c0_11 = arith.constant 0 : index
    %11 = vector.load %arg2[%c307, %c0_11] : memref<320x384xf32, #tpu.memory_space<vmem>>, vector<1x32xf32>
    %c308 = arith.constant 308 : index
    %c0_12 = arith.constant 0 : index
    %12 = vector.load %arg2[%c308, %c0_12] : memref<320x384xf32, #tpu.memory_space<vmem>>, vector<1x64xf32>
    %c309 = arith.constant 309 : index
    %c0_13 = arith.constant 0 : index
    %13 = vector.load %arg2[%c309, %c0_13] : memref<320x384xf32, #tpu.memory_space<vmem>>, vector<1x32xf32>
    %c310 = arith.constant 310 : index
    %c0_14 = arith.constant 0 : index
    %14 = vector.load %arg2[%c310, %c0_14] : memref<320x384xf32, #tpu.memory_space<vmem>>, vector<1x32xf32>
    %c311 = arith.constant 311 : index
    %c0_15 = arith.constant 0 : index
    %15 = vector.load %arg2[%c311, %c0_15] : memref<320x384xf32, #tpu.memory_space<vmem>>, vector<1x32xf32>
    %c312 = arith.constant 312 : index
    %c0_16 = arith.constant 0 : index
    %16 = vector.load %arg2[%c312, %c0_16] : memref<320x384xf32, #tpu.memory_space<vmem>>, vector<1x32xf32>
    %c313 = arith.constant 313 : index
    %c0_17 = arith.constant 0 : index
    %17 = vector.load %arg2[%c313, %c0_17] : memref<320x384xf32, #tpu.memory_space<vmem>>, vector<1x32xf32>
    %c314 = arith.constant 314 : index
    %c0_18 = arith.constant 0 : index
    %18 = vector.load %arg2[%c314, %c0_18] : memref<320x384xf32, #tpu.memory_space<vmem>>, vector<1x32xf32>
    %c315 = arith.constant 315 : index
    %c0_19 = arith.constant 0 : index
    %19 = vector.load %arg2[%c315, %c0_19] : memref<320x384xf32, #tpu.memory_space<vmem>>, vector<1x32xf32>
    %c316 = arith.constant 316 : index
    %c0_20 = arith.constant 0 : index
    %20 = vector.load %arg2[%c316, %c0_20] : memref<320x384xf32, #tpu.memory_space<vmem>>, vector<1x128xf32>
    %c0_21 = arith.constant 0 : index
    %c0_22 = arith.constant 0 : index
    %21 = vector.load %arg0[%c0_21, %c0_22] : memref<16x1xi32, #tpu.memory_space<vmem>>, vector<16x1xi32>
    %22 = tpu.iota {dimensions = array<i32: 1>} : vector<16x64xi32>
    %23 = vector.broadcast %21 : vector<16x1xi32> to vector<16x64xi32>
    %24 = arith.cmpi eq, %22, %23 : vector<16x64xi32>
    %25 = arith.extui %24 : vector<16x64xi1> to vector<16x64xi32>
    %26 = arith.sitofp %25 : vector<16x64xi32> to vector<16x64xf32>
    %cst = arith.constant dense<0.000000e+00> : vector<16x32xf32>
    %27 = tpu.matmul %26, %0, %cst {dimension_numbers = #tpu.dot_dimension_numbers<[1], [0], [0], [1], [0, 0, 1, 1], [], []>} : vector<16x64xf32>, vector<64x32xf32>, vector<16x32xf32> -> vector<16x32xf32>
    %28 = arith.addf %27, %1 : vector<16x32xf32>
    %cst_23 = arith.constant dense<0.000000e+00> : vector<16x384xf32>
    %29 = tpu.matmul %28, %2, %cst_23 {dimension_numbers = #tpu.dot_dimension_numbers<[1], [0], [0], [1], [0, 0, 1, 1], [], []>} : vector<16x32xf32>, vector<32x384xf32>, vector<16x384xf32> -> vector<16x384xf32>
    %30 = vector.broadcast %8 : vector<1x384xf32> to vector<16x384xf32>
    %31 = arith.addf %29, %30 : vector<16x384xf32>
    %32 = vector.extract_strided_slice %31 {offsets = [0, 0], sizes = [16, 32], strides = [1, 1]} : vector<16x384xf32> to vector<16x32xf32>
    %33 = vector.extract_strided_slice %31 {offsets = [0, 128], sizes = [16, 32], strides = [1, 1]} : vector<16x384xf32> to vector<16x32xf32>
    %34 = vector.extract_strided_slice %31 {offsets = [0, 256], sizes = [16, 32], strides = [1, 1]} : vector<16x384xf32> to vector<16x32xf32>
    %cst_24 = arith.constant dense<0.000000e+00> : vector<16x16xf32>
    %35 = tpu.matmul %32, %33, %cst_24 {dimension_numbers = #tpu.dot_dimension_numbers<[1], [1], [0], [0], [0, 0, 1, 0], [], []>} : vector<16x32xf32>, vector<16x32xf32>, vector<16x16xf32> -> vector<16x16xf32>
    %c0_25 = arith.constant 0 : index
    %c0_26 = arith.constant 0 : index
    %36 = vector.load %arg1[%c0_25, %c0_26] : memref<16x16xf32, #tpu.memory_space<vmem>>, vector<16x16xf32>
    %37 = arith.addf %35, %36 : vector<16x16xf32>
    %cst_27 = arith.constant dense<0xFF800000> : vector<16xf32>
    %38 = vector.multi_reduction <maximumf>, %37, %cst_27 [1] : vector<16x16xf32> to vector<16xf32>
    %39 = vector.shape_cast %38 : vector<16xf32> to vector<16x1xf32>
    %40 = vector.broadcast %39 : vector<16x1xf32> to vector<16x16xf32>
    %41 = arith.subf %37, %40 : vector<16x16xf32>
    %42 = math.exp %41 : vector<16x16xf32>
    %cst_28 = arith.constant dense<0.000000e+00> : vector<16xf32>
    %43 = vector.multi_reduction <add>, %42, %cst_28 [1] : vector<16x16xf32> to vector<16xf32>
    %44 = vector.shape_cast %43 : vector<16xf32> to vector<16x1xf32>
    %45 = tpu.reciprocal %44 {approx = true} : vector<16x1xf32> -> vector<16x1xf32>
    %46 = vector.broadcast %45 : vector<16x1xf32> to vector<16x16xf32>
    %47 = arith.mulf %42, %46 : vector<16x16xf32>
    %cst_29 = arith.constant dense<0.000000e+00> : vector<16x32xf32>
    %48 = tpu.matmul %47, %34, %cst_29 {dimension_numbers = #tpu.dot_dimension_numbers<[1], [0], [0], [1], [0, 0, 1, 1], [], []>} : vector<16x16xf32>, vector<16x32xf32>, vector<16x32xf32> -> vector<16x32xf32>
    %cst_30 = arith.constant dense<0.000000e+00> : vector<16x32xf32>
    %49 = tpu.matmul %48, %3, %cst_30 {dimension_numbers = #tpu.dot_dimension_numbers<[1], [0], [0], [1], [0, 0, 1, 1], [], []>} : vector<16x32xf32>, vector<32x32xf32>, vector<16x32xf32> -> vector<16x32xf32>
    %50 = vector.broadcast %9 : vector<1x32xf32> to vector<16x32xf32>
    %51 = arith.addf %49, %50 : vector<16x32xf32>
    %52 = arith.addf %28, %51 : vector<16x32xf32>
    %cst_31 = arith.constant dense<0.000000e+00> : vector<16xf32>
    %53 = vector.multi_reduction <add>, %52, %cst_31 [1] : vector<16x32xf32> to vector<16xf32>
    %54 = vector.shape_cast %53 : vector<16xf32> to vector<16x1xf32>
    %cst_32 = arith.constant 3.200000e+01 : f32
    %55 = vector.broadcast %cst_32 : f32 to vector<16x1xf32>
    %56 = arith.divf %54, %55 : vector<16x1xf32>
    %57 = vector.broadcast %56 : vector<16x1xf32> to vector<16x32xf32>
    %58 = arith.subf %52, %57 : vector<16x32xf32>
    %59 = arith.mulf %58, %58 : vector<16x32xf32>
    %cst_33 = arith.constant dense<0.000000e+00> : vector<16xf32>
    %60 = vector.multi_reduction <add>, %59, %cst_33 [1] : vector<16x32xf32> to vector<16xf32>
    %61 = vector.shape_cast %60 : vector<16xf32> to vector<16x1xf32>
    %cst_34 = arith.constant 3.200000e+01 : f32
    %62 = vector.broadcast %cst_34 : f32 to vector<16x1xf32>
    %63 = arith.divf %61, %62 : vector<16x1xf32>
    %64 = vector.broadcast %56 : vector<16x1xf32> to vector<16x32xf32>
    %65 = arith.subf %52, %64 : vector<16x32xf32>
    %cst_35 = arith.constant 9.99999996E-13 : f32
    %66 = vector.broadcast %cst_35 : f32 to vector<16x1xf32>
    %67 = arith.addf %63, %66 : vector<16x1xf32>
    %68 = math.rsqrt %67 : vector<16x1xf32>
    %69 = vector.broadcast %68 : vector<16x1xf32> to vector<16x32xf32>
    %70 = arith.mulf %65, %69 : vector<16x32xf32>
    %71 = vector.broadcast %10 : vector<1x32xf32> to vector<16x32xf32>
    %72 = arith.mulf %70, %71 : vector<16x32xf32>
    %73 = vector.broadcast %11 : vector<1x32xf32> to vector<16x32xf32>
    %74 = arith.addf %72, %73 : vector<16x32xf32>
    %cst_36 = arith.constant dense<0.000000e+00> : vector<16x64xf32>
    %75 = tpu.matmul %74, %4, %cst_36 {dimension_numbers = #tpu.dot_dimension_numbers<[1], [0], [0], [1], [0, 0, 1, 1], [], []>} : vector<16x32xf32>, vector<32x64xf32>, vector<16x64xf32> -> vector<16x64xf32>
    %76 = vector.broadcast %12 : vector<1x64xf32> to vector<16x64xf32>
    %77 = arith.addf %75, %76 : vector<16x64xf32>
    %78 = arith.mulf %77, %77 : vector<16x64xf32>
    %79 = arith.mulf %77, %78 : vector<16x64xf32>
    %cst_37 = arith.constant 4.471500e-02 : f32
    %80 = vector.broadcast %cst_37 : f32 to vector<16x64xf32>
    %81 = arith.mulf %80, %79 : vector<16x64xf32>
    %82 = arith.addf %77, %81 : vector<16x64xf32>
    %cst_38 = arith.constant 0.797884583 : f32
    %83 = vector.broadcast %cst_38 : f32 to vector<16x64xf32>
    %84 = arith.mulf %83, %82 : vector<16x64xf32>
    %85 = math.tanh %84 : vector<16x64xf32>
    %cst_39 = arith.constant 1.000000e+00 : f32
    %86 = vector.broadcast %cst_39 : f32 to vector<16x64xf32>
    %87 = arith.addf %86, %85 : vector<16x64xf32>
    %cst_40 = arith.constant 5.000000e-01 : f32
    %88 = vector.broadcast %cst_40 : f32 to vector<16x64xf32>
    %89 = arith.mulf %88, %87 : vector<16x64xf32>
    %90 = arith.mulf %77, %89 : vector<16x64xf32>
    %cst_41 = arith.constant dense<0.000000e+00> : vector<16x32xf32>
    %91 = tpu.matmul %90, %5, %cst_41 {dimension_numbers = #tpu.dot_dimension_numbers<[1], [0], [0], [1], [0, 0, 1, 1], [], []>} : vector<16x64xf32>, vector<64x32xf32>, vector<16x32xf32> -> vector<16x32xf32>
    %92 = vector.broadcast %13 : vector<1x32xf32> to vector<16x32xf32>
    %93 = arith.addf %91, %92 : vector<16x32xf32>
    %94 = arith.addf %74, %93 : vector<16x32xf32>
    %cst_42 = arith.constant dense<0.000000e+00> : vector<16xf32>
    %95 = vector.multi_reduction <add>, %94, %cst_42 [1] : vector<16x32xf32> to vector<16xf32>
    %96 = vector.shape_cast %95 : vector<16xf32> to vector<16x1xf32>
    %cst_43 = arith.constant 3.200000e+01 : f32
    %97 = vector.broadcast %cst_43 : f32 to vector<16x1xf32>
    %98 = arith.divf %96, %97 : vector<16x1xf32>
    %99 = vector.broadcast %98 : vector<16x1xf32> to vector<16x32xf32>
    %100 = arith.subf %94, %99 : vector<16x32xf32>
    %101 = arith.mulf %100, %100 : vector<16x32xf32>
    %cst_44 = arith.constant dense<0.000000e+00> : vector<16xf32>
    %102 = vector.multi_reduction <add>, %101, %cst_44 [1] : vector<16x32xf32> to vector<16xf32>
    %103 = vector.shape_cast %102 : vector<16xf32> to vector<16x1xf32>
    %cst_45 = arith.constant 3.200000e+01 : f32
    %104 = vector.broadcast %cst_45 : f32 to vector<16x1xf32>
    %105 = arith.divf %103, %104 : vector<16x1xf32>
    %106 = vector.broadcast %98 : vector<16x1xf32> to vector<16x32xf32>
    %107 = arith.subf %94, %106 : vector<16x32xf32>
    %cst_46 = arith.constant 9.99999996E-13 : f32
    %108 = vector.broadcast %cst_46 : f32 to vector<16x1xf32>
    %109 = arith.addf %105, %108 : vector<16x1xf32>
    %110 = math.rsqrt %109 : vector<16x1xf32>
    %111 = vector.broadcast %110 : vector<16x1xf32> to vector<16x32xf32>
    %112 = arith.mulf %107, %111 : vector<16x32xf32>
    %113 = vector.broadcast %14 : vector<1x32xf32> to vector<16x32xf32>
    %114 = arith.mulf %112, %113 : vector<16x32xf32>
    %115 = vector.broadcast %15 : vector<1x32xf32> to vector<16x32xf32>
    %116 = arith.addf %114, %115 : vector<16x32xf32>
    %cst_47 = arith.constant dense<0.000000e+00> : vector<16x384xf32>
    %117 = tpu.matmul %116, %6, %cst_47 {dimension_numbers = #tpu.dot_dimension_numbers<[1], [0], [0], [1], [0, 0, 1, 1], [], []>} : vector<16x32xf32>, vector<32x384xf32>, vector<16x384xf32> -> vector<16x384xf32>
    %118 = vector.extract_strided_slice %117 {offsets = [0, 0], sizes = [16, 32], strides = [1, 1]} : vector<16x384xf32> to vector<16x32xf32>
    %119 = vector.broadcast %16 : vector<1x32xf32> to vector<16x32xf32>
    %120 = arith.addf %118, %119 : vector<16x32xf32>
    %121 = arith.negf %120 : vector<16x32xf32>
    %122 = math.exp %121 : vector<16x32xf32>
    %cst_48 = arith.constant 1.000000e+00 : f32
    %123 = vector.broadcast %cst_48 : f32 to vector<16x32xf32>
    %124 = arith.addf %123, %122 : vector<16x32xf32>
    %125 = arith.divf %123, %124 : vector<16x32xf32>
    %126 = vector.extract_strided_slice %117 {offsets = [0, 128], sizes = [16, 32], strides = [1, 1]} : vector<16x384xf32> to vector<16x32xf32>
    %127 = vector.broadcast %17 : vector<1x32xf32> to vector<16x32xf32>
    %128 = arith.addf %126, %127 : vector<16x32xf32>
    %129 = arith.negf %128 : vector<16x32xf32>
    %130 = math.exp %129 : vector<16x32xf32>
    %cst_49 = arith.constant 1.000000e+00 : f32
    %131 = vector.broadcast %cst_49 : f32 to vector<16x32xf32>
    %132 = arith.addf %131, %130 : vector<16x32xf32>
    %133 = arith.divf %131, %132 : vector<16x32xf32>
    %134 = vector.extract_strided_slice %117 {offsets = [0, 256], sizes = [16, 32], strides = [1, 1]} : vector<16x384xf32> to vector<16x32xf32>
    %135 = vector.broadcast %18 : vector<1x32xf32> to vector<16x32xf32>
    %136 = arith.addf %134, %135 : vector<16x32xf32>
    %137 = vector.broadcast %19 : vector<1x32xf32> to vector<16x32xf32>
    %138 = arith.mulf %125, %137 : vector<16x32xf32>
    %139 = arith.addf %136, %138 : vector<16x32xf32>
    %140 = math.tanh %139 : vector<16x32xf32>
    %cst_50 = arith.constant 1.000000e+00 : f32
    %141 = vector.broadcast %cst_50 : f32 to vector<16x32xf32>
    %142 = arith.subf %141, %133 : vector<16x32xf32>
    %143 = arith.mulf %142, %140 : vector<16x32xf32>
    %cst_51 = arith.constant dense<0.000000e+00> : vector<16x128xf32>
    %144 = tpu.matmul %143, %7, %cst_51 {dimension_numbers = #tpu.dot_dimension_numbers<[1], [0], [0], [1], [0, 0, 1, 1], [], []>} : vector<16x32xf32>, vector<32x128xf32>, vector<16x128xf32> -> vector<16x128xf32>
    %145 = vector.broadcast %20 : vector<1x128xf32> to vector<16x128xf32>
    %146 = arith.addf %144, %145 : vector<16x128xf32>
    %c0_52 = arith.constant 0 : index
    %c0_53 = arith.constant 0 : index
    %147 = vector.load %arg3[%c0_52, %c0_53] : memref<16x128xf32, #tpu.memory_space<vmem>>, vector<16x128xf32>
    tpu.vector_store %arg3[%c0_52, %c0_53], %146 {strides = array<i32>} : memref<16x128xf32, #tpu.memory_space<vmem>>, vector<16x128xf32>,
    return
  }
}

</mosaic_0001>

<bundles_post_ra>
// kernel: mul.8
= control target key start
LH: loop header
LB: loop body
LE: loop exit
PB: predicated region body
PF: predicated region fallthrough
CT: control target
= control target key end

     0   :  { %2 = vsyncpa [#allocation1], 0  ;;  %s62_s8 = smov [#allocation0]   ;;  %s80_s0 = inlined_call_operand.hbm [shape: f32[2,8], index: 0, kind: input, shape index: {}]   ;;  %s81_s1 = inlined_call_operand.vmem [shape: f32[16], index: 1, kind: output, shape index: {}]  }
   0x1   :  { %s6_s0 = sshll.u32 %s80_s0, 4  ;;  %s8_s9 = sshll.u32 %s62_s8, 4  ;;  %s7_s0 = int_to_ptr.hbm [resolvable:$true] %s6_s0  ;;  %s9_s9 = int_to_ptr.vmem [resolvable:$true] %s8_s9 }
   0x2   :  { %11 = dma.hbm_to_vmem [thread:$0]  %s7_s0, 32, %s9_s9, [#allocation1]  }
   0x3   :  { %60 = dma.done.wait [#allocation1], 32  }
   0x4   :  { %61 = vsyncadd [#allocation1], 4294967264  ;;  %v16_v0 = vld [vmem:[#allocation0] sm:$0x3]  ;;  %vm19_vm0 = vcmask 64512   ;;  %s63_s10 = smov 8  }
   0x5   :  { %17 = vst [vmem:[#allocation3] sm:$0x3] %v16_v0  ;;  %vm25_vm1 = vcmask 130112  }
   0xc   :  { %v18_v1 = vld [vmem:[#allocation3] sm:$0x1]   ;;  %v22_v2 = vld [vmem:[#allocation3 + $0x1] sm:$0x1]  }
   0xd   :  { %23 = vrot.lane.b32.xlu0 %v22_v2, %s63_s10  ;;  %20 = vst.msk [vmem:[#allocation2] sm:$0x1] %vm19_vm0, %v18_v1  }
  0x7f   :  { %v24_v3 = vpop.permute.xlu0 %23  }
  0x80   :  { %26 = vst.msk [vmem:[#allocation2] sm:$0x1] %vm25_vm1, %v24_v3  }
  0x87   :  { %v29_v4 = vld [vmem:[#allocation2] sm:$0x1] }
  0x88   :  { %32 = vst [vmem:[%s81_s1] sm:$0x1] %v29_v4 }
  0x89   :  { %33 = vsyncpa [#allocation1], 1 }

// kernel: bert_gru_forward.1
= control target key start
LH: loop header
LB: loop body
LE: loop exit
PB: predicated region body
PF: predicated region fallthrough
CT: control target
= control target key end

     0   :  { %8 = vsyncpa [#allocation3], 0  ;;  %s844_s15 = smov [#allocation2]   ;;  %s845_s17 = smov 384   ;;  %s971_s0 = inlined_call_operand.vmem [shape: s32[16,1], index: 0, kind: input, shape index: {}]   ;;  %s972_s1 = inlined_call_operand.vmem [shape: f32[16,16], index: 1, kind: input, shape index: {}]   ;;  %s973_s2 = inlined_call_operand.hbm [shape: f32[320,384], index: 2, kind: input, shape index: {}]   ;;  %s974_s3 = inlined_call_operand.vmem [shape: f32[16,128], index: 3, kind: output, shape index: {}]  }
   0x1   :  { %s17_s14 = sshll.u32 %s973_s2, 4  ;;  %s19_s16 = sshll.u32 %s844_s15, 4  ;;  %s18_s14 = int_to_ptr.hbm [resolvable:$true] %s17_s14  ;;  %s20_s16 = int_to_ptr.vmem [resolvable:$true] %s19_s16 }
   0x2   :  { %s846_s18 = smov 24  }
   0x3   :  { %25 = dma.hbm_to_vmem [thread:$0]  %s18_s14, 15360, %s20_s16, [#allocation3], %s845_s17, %s845_s17, %s846_s18  }
   0x4   :  { %842 = dma.done.wait [#allocation3], 15360  }
   0x5   :  { %843 = vsyncadd [#allocation3], 4294951936  ;;  %v847_v0 = vmov 0   ;;  %v98_v1 = vld [vmem:[%s971_s0] sm:$0xff]  ;;  %v37_v2 = vld [vmem:[#allocation2 + $0xa8] sm:$0xff]  ;;  %v100_v15 = vlaneseq  ;;  %vm114_vm0 = vcmask 523264  }
   0x6   :  { %775 = vset.pattern.permute.xlu0 %v847_v0  ;;  %129 = vmatpush.msra.mxu0 %v37_v2  ;;  %v36_v3 = vld [vmem:[#allocation2 + $0x90] sm:$0xff]  ;;  %v35_v4 = vld [vmem:[#allocation2 + $0x78] sm:$0xff]  ;;  %v34_v5 = vld [vmem:[#allocation2 + $0x60] sm:$0xff]  ;;  %v848_v18 = vmov 0.0   ;;  %vm151_vm3 = vcmask 261120   ;;  %vm264_vm4 = vcmask 130048  }
   0x7   :  { %103 = vperm.xlu0 %775, %v98_v1   ;;  %v99_v6 = vld [vmem:[%s971_s0 + $0x8] sm:$0xff]  ;;  %v32_v8 = vld [vmem:[#allocation2 + $0x30] sm:$0xff]  ;;  %v31_v9 = vld [vmem:[#allocation2 + $0x18] sm:$0xff]  ;;  %v101_v16 = vand.u32 127, %v100_v15 }
   0x8   :  { %130 = vmatpush.msra.mxu0 %v36_v3  ;;  %v33_v7 = vld [vmem:[#allocation2 + $0x48] sm:$0xff]  ;;  %v30_v10 = vld [vmem:[#allocation2] sm:$0xff]  ;;  %v49_v11 = vld [vmem:[#allocation2 + $0x138] sm:$0xff] }
   0x9   :  { %v51_v12 = vld [vmem:[#allocation2 + $0x148] sm:$0xff]  ;;  %v46_v13 = vld [vmem:[#allocation2 + $0x120] sm:$0xff]  ;;  %170 = vmatpush.msra.mxu1 %v49_v11  ;;  %v48_v14 = vld [vmem:[#allocation2 + $0x130] sm:$0xff]  ;;  %765 = vmatpush.msra.mxu2 %v49_v11 }
   0xa   :  { %131 = vmatpush.msra.mxu0 %v35_v4  ;;  %216 = vmatpush.msra.mxu3 %v51_v12  ;;  %v43_v22 = vld [vmem:[#allocation2 + $0x108] sm:$0xff]  ;;  %v45_v23 = vld [vmem:[#allocation2 + $0x118] sm:$0xff]  ;;  %v40_v24 = vld [vmem:[#allocation2 + $0xf0] sm:$0xff] }
   0xb   :  { %171 = vmatpush.msra.mxu1 %v46_v13  ;;  %766 = vmatpush.msra.mxu2 %v46_v13  ;;  %v42_v25 = vld [vmem:[#allocation2 + $0x100] sm:$0xff]  ;;  %v47_v27 = vld [vmem:[#allocation2 + $0x128] sm:$0xff]  ;;  %v44_v28 = vld [vmem:[#allocation2 + $0x110] sm:$0xff] }
   0xc   :  { %132 = vmatpush.msra.mxu0 %v34_v5  ;;  %217 = vmatpush.msra.mxu3 %v48_v14  ;;  %v50_v26 = vld [vmem:[#allocation2 + $0x140] sm:$0xff]  ;;  %v41_v29 = vld [vmem:[#allocation2 + $0xf8] sm:$0xff]  ;;  %v228_v56 = vld [vmem:[%s972_s1 + $0x8] sm:$0xff] }
   0xd   :  { %172 = vmatpush.msra.mxu1 %v43_v22  ;;  %767 = vmatpush.msra.mxu2 %v43_v22  ;;  %v38_v30 = vld [vmem:[#allocation2 + $0xc0] sm:$0xff]  ;;  %v39_v33 = vld [vmem:[#allocation2 + $0xd8] sm:$0xff] }
   0xe   :  { %133 = vmatpush.msra.mxu0 %v33_v7  ;;  %218 = vmatpush.msra.mxu3 %v45_v23  ;;  %v85_v37 = vld [vmem:[#allocation2 + $0x390] ss:$8 sm:$0x7] }
   0xf   :  { %106 = vperm.xlu0 %775, %v99_v6   ;;  %173 = vmatpush.msra.mxu1 %v40_v24  ;;  %v147_v38 = vperm.slane %v85_v37, 2  ;;  %v146_v44 = vperm.slane %v85_v37, 1  ;;  %v145_v47 = vperm.slane %v85_v37, 0  ;;  %v227_v52 = vld [vmem:[%s972_s1] sm:$0xff]  ;;  %v55_v6 = vld [vmem:[#allocation2 + $0x198] sm:$0xff] }
  0x10   :  { %134 = vmatpush.msra.mxu0 %v32_v8  ;;  %219 = vmatpush.msra.mxu3 %v42_v25  ;;  %v54_v7 = vld [vmem:[#allocation2 + $0x180] sm:$0xff]  ;;  %v53_v8 = vld [vmem:[#allocation2 + $0x168] sm:$0xff] }
  0x11   :  { %768 = vmatpush.msra.mxu2 %v40_v24 }
  0x12   :  { %135 = vmatpush.msra.mxu0 %v31_v9  ;;  %334 = vmatpush.msrb.mxu3 %v55_v6  ;;  %v52_v9 = vld [vmem:[#allocation2 + $0x150] sm:$0xff] }
  0x13   :  { %193 = vmatpush.msrb.mxu2 %v50_v26 }
  0x14   :  { %136 = vmatpush.msra.mxu0 %v30_v10  ;;  %335 = vmatpush.msrb.mxu3 %v54_v7 }
  0x15   :  { %194 = vmatpush.msrb.mxu2 %v47_v27  ;;  %v849_v27 = vmov 32.0  }
  0x16   :  { %336 = vmatpush.msrb.mxu3 %v53_v8 }
  0x17   :  { %195 = vmatpush.msrb.mxu2 %v44_v28 }
  0x18   :  { %337 = vmatpush.msrb.mxu3 %v52_v9 }
  0x19   :  { %196 = vmatpush.msrb.mxu2 %v41_v29 }
  0x79   :  { %v104_v17 = vpop.permute.xlu0 %103 }
  0x7a   :  { %vm108_vm1 = vcmp.eq.s32.totalorder %v101_v16, %v104_v17 }
  0x7b   :  { %v731_v19 = vsel %vm108_vm1, 1.0, %v848_v18 }
  0x7c   :  { %733 = vmatmul.msk.f32.vlgmr.msra.gmra.mxu0 %vm114_vm0, %v731_v19 }
  0x81   :  { %v107_v20 = vpop.permute.xlu0 %106 }
  0x82   :  { %vm109_vm2 = vcmp.eq.s32.totalorder %v101_v16, %v107_v20 }
  0x83   :  { %v732_v21 = vsel %vm109_vm2, 1.0, %v848_v18  ;;  %v86_v18 = vld [vmem:[#allocation2 + $0x391] ss:$0 sm:$0xff] }
  0x84   :  { %734 = vmatmul.msk.f32.gmra.mxu0 %vm114_vm0, %v732_v21 }
  0xf9   :  { %v138_v31 = vpop.f32.mrf.mxu0 }
  0xfa   :  { %v881_v32 = vadd.f32 %v138_v31, %v38_v30 }
  0xfc   :  { %735 = vmatmul.msk.f32.vlgmr.msra.gmra.mxu1 %vm151_vm3, %v881_v32  ;;  %739 = vmatmul.msk.f32.vlgmr.msra.gmra.mxu3 %vm151_vm3, %v881_v32 }
 0x101   :  { %v141_v34 = vpop.f32.mrf.mxu0 }
 0x102   :  { %v887_v35 = vadd.f32 %v141_v34, %v39_v33 }
 0x104   :  { %736 = vmatmul.msk.f32.vlgmr.msra.gmra.mxu2 %vm151_vm3, %v887_v35  ;;  %740 = vmatmul.msk.f32.gmra.mxu3 %vm151_vm3, %v887_v35 }
 0x10c   :  { %737 = vmatmul.msk.f32.vlgmr.msrb.gmra.mxu2 %vm151_vm3, %v881_v32 }
 0x114   :  { %738 = vmatmul.msk.f32.gmra.mxu2 %vm151_vm3, %v887_v35 }
 0x179   :  { %v175_v48 = vpop.f32.mrf.mxu1 }
 0x17a   :  { %v176_v50 = vadd.f32 %v175_v48, %v145_v47 }
 0x17f   :  { %v221_v36 = vpop.f32.mrf.mxu3 }
 0x180   :  { %v222_v42 = vadd.f32 %v221_v36, %v147_v38 }
 0x187   :  { %v178_v39 = vpop.f32.mrf.mxu2  ;;  %v224_v40 = vpop.f32.mrf.mxu3 }
 0x188   :  { %v225_v41 = vadd.f32 %v224_v40, %v147_v38  ;;  %v179_v51 = vadd.f32 %v178_v39, %v145_v47  ;;  %v56_v47 = vld [vmem:[#allocation2 + $0x1b0] sm:$0xff] }
 0x18a   :  { %307 = vmatpush.msra.mxu2 %v225_v41 }
 0x18c   :  { %308 = vmatpush.msra.mxu2 %v222_v42 }
 0x18f   :  { %v198_v43 = vpop.f32.mrf.mxu2 }
 0x190   :  { %v199_v49 = vadd.f32 %v198_v43, %v146_v44 }
 0x197   :  { %v201_v45 = vpop.f32.mrf.mxu2 }
 0x198   :  { %v202_v46 = vadd.f32 %v201_v45, %v146_v44  ;;  %v59_v44 = vld [vmem:[#allocation2 + $0x1f8] sm:$0xff]  ;;  %v58_v45 = vld [vmem:[#allocation2 + $0x1e0] sm:$0xff] }
 0x199   :  { %420 = vmatpush.msrb.mxu0 %v59_v44  ;;  %v90_v44 = vld [vmem:[#allocation2 + $0x395] ss:$0 sm:$0xff] }
 0x19a   :  { %741 = vmatpush.xpose.msk.msrb.mxu1 %vm151_vm3, %v202_v46  ;;  %v57_v46 = vld [vmem:[#allocation2 + $0x1c8] sm:$0xff] }
 0x19b   :  { %421 = vmatpush.msrb.mxu0 %v58_v45 }
 0x19d   :  { %422 = vmatpush.msrb.mxu0 %v57_v46 }
 0x19e   :  { %742 = vmatpush.xpose.msk.msrb.mxu1 %vm151_vm3, %v199_v49 }
 0x19f   :  { %423 = vmatpush.msrb.mxu0 %v56_v47 }
 0x1a1   :  { %743 = vmatmul.msk.f32.vlgmr.msrb.gmra.mxu1 %vm151_vm3, %v176_v50 }
 0x1a9   :  { %744 = vmatmul.msk.f32.gmra.mxu1 %vm151_vm3, %v179_v51 }
 0x21e   :  { %v258_v53 = vpop.f32.mrf.mxu1 }
 0x21f   :  { %v259_v54 = vadd.f32 %v258_v53, %v227_v52 }
 0x221   :  { %v265_v55 = vsel %vm264_vm4, %v259_v54, -inf }
 0x222   :  { %266 = vmax.xlane.f32.xlu1 %v265_v55 }
 0x226   :  { %v261_v57 = vpop.f32.mrf.mxu1 }
 0x227   :  { %v262_v58 = vadd.f32 %v261_v57, %v228_v56 }
 0x229   :  { %v268_v59 = vsel %vm264_vm4, %v262_v58, -inf }
 0x22a   :  { %269 = vmax.xlane.f32.xlu1 %v268_v59 }
 0x295   :  { %v267_v60 = vpop.xlane.xlu1 %266 }
 0x296   :  { %v271_v61 = vsub.f32 %v259_v54, %v267_v60 }
 0x298   :  { %v273_v62 = vmul.f32 1.442695, %v271_v61 }
 0x29a   :  { %776 = vpow2.f32 %v273_v62 }
 0x29d   :  { %v270_v63 = vpop.xlane.xlu1 %269 }
 0x29e   :  { %v272_v0 = vsub.f32 %v262_v58, %v270_v63 }
 0x2a0   :  { %v777_v1 = vpop.eup %776  ;;  %v275_v2 = vmul.f32 1.442695, %v272_v0  ;;  %v87_v0 = vld [vmem:[#allocation2 + $0x392] ss:$0 sm:$0xff] }
 0x2a1   :  { %v277_v3 = vsel %vm264_vm4, %v777_v1, 0.0 }
 0x2a2   :  { %778 = vpow2.f32 %v275_v2  ;;  %278 = vadd.xlane.f32.xlu2 %v277_v3  ;;  %v88_v3 = vld [vmem:[#allocation2 + $0x393] ss:$0 sm:$0xff] }
 0x2a8   :  { %v779_v4 = vpop.eup %778 }
 0x2a9   :  { %v280_v5 = vsel %vm264_vm4, %v779_v4, 0.0 }
 0x2aa   :  { %281 = vadd.xlane.f32.xlu2 %v280_v5 }
 0x315   :  { %v279_v10 = vpop.xlane.xlu2 %278 }
 0x316   :  { %780 = vrcp.f32 %v279_v10 }
 0x31c   :  { %v781_v11 = vpop.eup %780 }
 0x31d   :  { %v285_v12 = vmul.f32 %v781_v11, %v777_v1  ;;  %v282_v13 = vpop.xlane.xlu2 %281 }
 0x31e   :  { %782 = vrcp.f32 %v282_v13  ;;  %v66_v13 = vld [vmem:[#allocation2 + $0x2a0] sm:$0xff] }
 0x31f   :  { %745 = vmatmul.msk.f32.vlgmr.msra.gmra.mxu2 %vm264_vm4, %v285_v12  ;;  %784 = vrcp.f32 %v849_v27  ;;  %v67_v12 = vld [vmem:[#allocation2 + $0x2b8] sm:$0xff] }
 0x320   :  { %463 = vmatpush.msra.mxu1 %v67_v12 }
 0x322   :  { %464 = vmatpush.msra.mxu1 %v66_v13 }
 0x324   :  { %v783_v14 = vpop.eup %782 }
 0x325   :  { %v286_v15 = vmul.f32 %v783_v14, %v779_v4  ;;  %v785_v28 = vpop.eup %784  ;;  %v65_v14 = vld [vmem:[#allocation2 + $0x288] sm:$0xff] }
 0x326   :  { %v354_v29 = vmul.f32 32.0, %v785_v28  ;;  %vm358_vm5 = vweird.f32 %v785_v28  ;;  %465 = vmatpush.msra.mxu1 %v65_v14 }
 0x327   :  { %746 = vmatmul.msk.f32.gmra.mxu2 %vm264_vm4, %v286_v15  ;;  %v64_v15 = vld [vmem:[#allocation2 + $0x270] sm:$0xff] }
 0x328   :  { %v355_v30 = vsub.f32 1.0, %v354_v29  ;;  %466 = vmatpush.msra.mxu1 %v64_v15 }
 0x32a   :  { %v356_v31 = vmul.f32 %v785_v28, %v355_v30 }
 0x32c   :  { %v357_v33 = vadd.f32 %v785_v28, %v356_v31 }
 0x32e   :  { %v919_v34 = vsel %vm358_vm5, %v785_v28, %v357_v33 }
 0x3a2   :  { %v310_v16 = vpop.f32.mrf.mxu2 }
 0x3a3   :  { %747 = vmatmul.msk.f32.vlgmr.msrb.gmra.mxu3 %vm151_vm3, %v310_v16  ;;  %v63_v16 = vld [vmem:[#allocation2 + $0x258] sm:$0xff] }
 0x3a4   :  { %467 = vmatpush.msra.mxu1 %v63_v16 }
 0x3aa   :  { %v313_v17 = vpop.f32.mrf.mxu2 }
 0x3ab   :  { %748 = vmatmul.msk.f32.gmra.mxu3 %vm151_vm3, %v313_v17  ;;  %v62_v17 = vld [vmem:[#allocation2 + $0x240] sm:$0xff] }
 0x3ac   :  { %468 = vmatpush.msra.mxu1 %v62_v17 }
 0x426   :  { %v339_v19 = vpop.f32.mrf.mxu3 }
 0x427   :  { %v340_v20 = vadd.f32 %v339_v19, %v86_v18  ;;  %v60_v19 = vld [vmem:[#allocation2 + $0x210] sm:$0xff] }
 0x429   :  { %v345_v21 = vadd.f32 %v340_v20, %v881_v32  ;;  %v89_v20 = vld [vmem:[#allocation2 + $0x394] ss:$0 sm:$0xff] }
 0x42b   :  { %v347_v22 = vsel %vm151_vm3, %v345_v21, 0.0 }
 0x42c   :  { %348 = vadd.xlane.f32.xlu0 %v347_v22 }
 0x42e   :  { %v342_v23 = vpop.f32.mrf.mxu3 }
 0x42f   :  { %v343_v24 = vadd.f32 %v342_v23, %v86_v18  ;;  %v61_v18 = vld [vmem:[#allocation2 + $0x228] sm:$0xff] }
 0x430   :  { %469 = vmatpush.msra.mxu1 %v61_v18 }
 0x431   :  { %v346_v25 = vadd.f32 %v343_v24, %v887_v35 }
 0x432   :  { %470 = vmatpush.msra.mxu1 %v60_v19 }
 0x433   :  { %v350_v26 = vsel %vm151_vm3, %v346_v25, 0.0 }
 0x434   :  { %351 = vadd.xlane.f32.xlu1 %v350_v26 }
 0x49f   :  { %v349_v32 = vpop.xlane.xlu0 %348 }
 0x4a0   :  { %v360_v36 = vmul.f32 %v919_v34, %v349_v32 }
 0x4a2   :  { %v362_v37 = vsub.f32 %v345_v21, %v360_v36 }
 0x4a4   :  { %v364_v38 = vmul.f32 %v362_v37, %v362_v37 }
 0x4a6   :  { %v366_v35 = vsel %vm151_vm3, %v364_v38, 0.0 }
 0x4a7   :  { %367 = vadd.xlane.f32.xlu2 %v366_v35  ;;  %v352_v39 = vpop.xlane.xlu1 %351 }
 0x4a8   :  { %v361_v40 = vmul.f32 %v919_v34, %v352_v39 }
 0x4aa   :  { %v363_v41 = vsub.f32 %v346_v25, %v361_v40 }
 0x4ac   :  { %v365_v42 = vmul.f32 %v363_v41, %v363_v41 }
 0x4ae   :  { %v369_v43 = vsel %vm151_vm3, %v365_v42, 0.0 }
 0x4af   :  { %370 = vadd.xlane.f32.xlu1 %v369_v43 }
 0x51a   :  { %v368_v48 = vpop.xlane.xlu2 %367 }
 0x51b   :  { %v372_v49 = vmul.f32 %v368_v48, %v919_v34 }
 0x51d   :  { %v374_v50 = vadd.f32 1e-12, %v372_v49 }
 0x51f   :  { %786 = vrsqrt.f32 %v374_v50  ;;  %vm382_vm7 = vweird.f32 %v374_v50 }
 0x522   :  { %v371_v51 = vpop.xlane.xlu1 %370 }
 0x523   :  { %v373_v52 = vmul.f32 %v371_v51, %v919_v34 }
 0x525   :  { %v787_v53 = vpop.eup %786  ;;  %v375_v54 = vadd.f32 1e-12, %v373_v52 }
 0x526   :  { %v377_v55 = vmul.f32 %v787_v53, %v374_v50  ;;  %vm383_vm6 = vweird.f32 %v787_v53 }
 0x527   :  { %788 = vrsqrt.f32 %v375_v54  ;;  %vm384_vm8 = vmor %vm382_vm7, %vm383_vm6  ;;  %vm392_vm10 = vweird.f32 %v375_v54 }
 0x528   :  { %v378_v56 = vmul.f32 %v787_v53, %v377_v55 }
 0x52a   :  { %v379_v57 = vmul.f32 0.5, %v378_v56 }
 0x52c   :  { %v380_v58 = vsub.f32 1.5, %v379_v57 }
 0x52d   :  { %v789_v59 = vpop.eup %788 }
 0x52e   :  { %v381_v60 = vmul.f32 %v787_v53, %v380_v58  ;;  %v387_v61 = vmul.f32 %v789_v59, %v375_v54  ;;  %vm393_vm9 = vweird.f32 %v789_v59 }
 0x52f   :  { %vm394_vm11 = vmor %vm392_vm10, %vm393_vm9 }
 0x530   :  { %v385_v62 = vsel %vm384_vm8, %v787_v53, %v381_v60  ;;  %v388_v63 = vmul.f32 %v789_v59, %v387_v61 }
 0x531   :  { %v396_v1 = vmul.f32 %v385_v62, %v362_v37 }
 0x532   :  { %v389_v2 = vmul.f32 0.5, %v388_v63  ;;  %v77_v63 = vld [vmem:[#allocation2 + $0x318] sm:$0xff] }
 0x533   :  { %v398_v4 = vmul.f32 %v396_v1, %v87_v0  ;;  %v79_v1 = vld [vmem:[#allocation2 + $0x328] sm:$0xff]  ;;  %546 = vmatpush.msrb.mxu2 %v77_v63 }
 0x534   :  { %v390_v5 = vsub.f32 1.5, %v389_v2  ;;  %v74_v2 = vld [vmem:[#allocation2 + $0x300] sm:$0xff]  ;;  %592 = vmatpush.msra.mxu0 %v79_v1 }
 0x535   :  { %v400_v6 = vadd.f32 %v398_v4, %v88_v3  ;;  %v76_v4 = vld [vmem:[#allocation2 + $0x310] sm:$0xff]  ;;  %547 = vmatpush.msrb.mxu2 %v74_v2 }
 0x536   :  { %v391_v7 = vmul.f32 %v789_v59, %v390_v5  ;;  %v71_v5 = vld [vmem:[#allocation2 + $0x2e8] sm:$0xff]  ;;  %593 = vmatpush.msra.mxu0 %v76_v4 }
 0x537   :  { %749 = vmatmul.msk.f32.vlgmr.msrb.gmra.mxu0 %vm151_vm3, %v400_v6  ;;  %548 = vmatpush.msrb.mxu2 %v71_v5 }
 0x538   :  { %v395_v8 = vsel %vm394_vm11, %v789_v59, %v391_v7  ;;  %v73_v7 = vld [vmem:[#allocation2 + $0x2f8] sm:$0xff] }
 0x539   :  { %v397_v9 = vmul.f32 %v395_v8, %v363_v41  ;;  %v68_v8 = vld [vmem:[#allocation2 + $0x2d0] sm:$0xff]  ;;  %594 = vmatpush.msra.mxu0 %v73_v7 }
 0x53a   :  { %549 = vmatpush.msrb.mxu2 %v68_v8 }
 0x53b   :  { %v399_v10 = vmul.f32 %v397_v9, %v87_v0  ;;  %v78_v0 = vld [vmem:[#allocation2 + $0x320] sm:$0xff]  ;;  %v69_v9 = vld [vmem:[#allocation2 + $0x2d8] sm:$0xff] }
 0x53c   :  { %569 = vmatpush.msra.mxu3 %v78_v0 }
 0x53d   :  { %v401_v11 = vadd.f32 %v399_v10, %v88_v3  ;;  %v75_v3 = vld [vmem:[#allocation2 + $0x308] sm:$0xff]  ;;  %v70_v10 = vld [vmem:[#allocation2 + $0x2e0] sm:$0xff] }
 0x53e   :  { %570 = vmatpush.msra.mxu3 %v75_v3  ;;  %595 = vmatpush.msra.mxu0 %v70_v10 }
 0x53f   :  { %750 = vmatmul.msk.f32.gmra.mxu0 %vm151_vm3, %v401_v11 }
 0x5b4   :  { %v425_v21 = vpop.f32.mrf.mxu0 }
 0x5b5   :  { %v426_v22 = vadd.f32 %v425_v21, %v89_v20 }
 0x5b7   :  { %v431_v23 = vmul.f32 %v426_v22, %v426_v22 }
 0x5b9   :  { %v433_v24 = vmul.f32 %v431_v23, %v426_v22 }
 0x5bb   :  { %v435_v25 = vmul.f32 0.044715, %v433_v24 }
 0x5bc   :  { %v428_v26 = vpop.f32.mrf.mxu0 }
 0x5bd   :  { %v437_v27 = vadd.f32 %v435_v25, %v426_v22  ;;  %v429_v28 = vadd.f32 %v428_v26, %v89_v20  ;;  %v91_v25 = vld [vmem:[#allocation2 + $0x396] ss:$0 sm:$0xff] }
 0x5bf   :  { %v439_v29 = vmul.f32 0.7978846, %v437_v27  ;;  %v432_v30 = vmul.f32 %v429_v28, %v429_v28 }
 0x5c1   :  { %790 = vtanh.f32 %v439_v29  ;;  %v434_v31 = vmul.f32 %v432_v30, %v429_v28  ;;  %v92_v30 = vld [vmem:[#allocation2 + $0x397] ss:$0 sm:$0xff] }
 0x5c3   :  { %v436_v33 = vmul.f32 0.044715, %v434_v31 }
 0x5c5   :  { %v438_v32 = vadd.f32 %v436_v33, %v429_v28 }
 0x5c7   :  { %v791_v36 = vpop.eup %790  ;;  %v440_v37 = vmul.f32 0.7978846, %v438_v32 }
 0x5c8   :  { %v443_v38 = vadd.f32 1.0, %v791_v36 }
 0x5c9   :  { %792 = vtanh.f32 %v440_v37 }
 0x5ca   :  { %v445_v35 = vmul.f32 0.5, %v443_v38 }
 0x5cc   :  { %v447_v39 = vmul.f32 %v445_v35, %v426_v22 }
 0x5ce   :  { %751 = vmatmul.msk.f32.vlgmr.msra.gmra.mxu1 %vm114_vm0, %v447_v39  ;;  %v93_v39 = vld [vmem:[#allocation2 + $0x3a8] ss:$0 sm:$0xff] }
 0x5cf   :  { %v793_v40 = vpop.eup %792 }
 0x5d0   :  { %v444_v41 = vadd.f32 1.0, %v793_v40  ;;  %v94_v40 = vld [vmem:[#allocation2 + $0x3a9] ss:$0 sm:$0xff] }
 0x5d2   :  { %v446_v42 = vmul.f32 0.5, %v444_v41 }
 0x5d4   :  { %v448_v43 = vmul.f32 %v446_v42, %v429_v28 }
 0x5d6   :  { %752 = vmatmul.msk.f32.gmra.mxu1 %vm114_vm0, %v448_v43 }
 0x64b   :  { %v472_v45 = vpop.f32.mrf.mxu1 }
 0x64c   :  { %v473_v46 = vadd.f32 %v472_v45, %v90_v44 }
 0x64e   :  { %v478_v47 = vadd.f32 %v473_v46, %v400_v6  ;;  %v72_v6 = vld [vmem:[#allocation2 + $0x2f0] sm:$0xff] }
 0x64f   :  { %571 = vmatpush.msra.mxu3 %v72_v6 }
 0x650   :  { %v480_v48 = vsel %vm151_vm3, %v478_v47, 0.0 }
 0x651   :  { %481 = vadd.xlane.f32.xlu2 %v480_v48  ;;  %572 = vmatpush.msra.mxu3 %v69_v9  ;;  %v82_v48 = vld [vmem:[#allocation2 + $0x360] sm:$0xff] }
 0x653   :  { %v475_v49 = vpop.f32.mrf.mxu1 }
 0x654   :  { %v476_v50 = vadd.f32 %v475_v49, %v90_v44  ;;  %v81_v49 = vld [vmem:[#allocation2 + $0x348] sm:$0xff] }
 0x656   :  { %v479_v51 = vadd.f32 %v476_v50, %v401_v11  ;;  %v80_v50 = vld [vmem:[#allocation2 + $0x330] sm:$0xff] }
 0x658   :  { %v483_v52 = vsel %vm151_vm3, %v479_v51, 0.0 }
 0x659   :  { %484 = vadd.xlane.f32.xlu1 %v483_v52 }
 0x6c4   :  { %v482_v53 = vpop.xlane.xlu2 %481 }
 0x6c5   :  { %v486_v54 = vmul.f32 %v482_v53, %v919_v34 }
 0x6c7   :  { %v488_v55 = vsub.f32 %v478_v47, %v486_v54  ;;  %v83_v47 = vld [vmem:[#allocation2 + $0x378] sm:$0xff] }
 0x6c8   :  { %713 = vmatpush.msrb.mxu1 %v83_v47 }
 0x6c9   :  { %v490_v56 = vmul.f32 %v488_v55, %v488_v55 }
 0x6ca   :  { %714 = vmatpush.msrb.mxu1 %v82_v48 }
 0x6cb   :  { %v492_v57 = vsel %vm151_vm3, %v490_v56, 0.0 }
 0x6cc   :  { %v485_v58 = vpop.xlane.xlu1 %484  ;;  %493 = vadd.xlane.f32.xlu2 %v492_v57  ;;  %715 = vmatpush.msrb.mxu1 %v81_v49 }
 0x6cd   :  { %v487_v59 = vmul.f32 %v485_v58, %v919_v34 }
 0x6ce   :  { %716 = vmatpush.msrb.mxu1 %v80_v50 }
 0x6cf   :  { %v936_v60 = vsub.f32 %v479_v51, %v487_v59 }
 0x6d1   :  { %v491_v61 = vmul.f32 %v936_v60, %v936_v60 }
 0x6d3   :  { %v495_v62 = vsel %vm151_vm3, %v491_v61, 0.0 }
 0x6d4   :  { %496 = vadd.xlane.f32.xlu1 %v495_v62 }
 0x73f   :  { %v494_v11 = vpop.xlane.xlu2 %493 }
 0x740   :  { %v498_v12 = vmul.f32 %v494_v11, %v919_v34 }
 0x742   :  { %v500_v13 = vadd.f32 1e-12, %v498_v12 }
 0x744   :  { %794 = vrsqrt.f32 %v500_v13  ;;  %vm508_vm13 = vweird.f32 %v500_v13 }
 0x747   :  { %v497_v14 = vpop.xlane.xlu1 %496 }
 0x748   :  { %v499_v15 = vmul.f32 %v497_v14, %v919_v34  ;;  %v95_v14 = vld [vmem:[#allocation2 + $0x3aa] ss:$0 sm:$0xff] }
 0x74a   :  { %v795_v16 = vpop.eup %794  ;;  %v501_v17 = vadd.f32 1e-12, %v499_v15  ;;  %v96_v15 = vld [vmem:[#allocation2 + $0x3ab] ss:$0 sm:$0xff] }
 0x74b   :  { %v503_v18 = vmul.f32 %v795_v16, %v500_v13  ;;  %vm509_vm12 = vweird.f32 %v795_v16 }
 0x74c   :  { %796 = vrsqrt.f32 %v501_v17  ;;  %vm510_vm14 = vmor %vm508_vm13, %vm509_vm12  ;;  %vm518_vm0 = vweird.f32 %v501_v17 }
 0x74d   :  { %v504_v19 = vmul.f32 %v795_v16, %v503_v18 }
 0x74f   :  { %v505_v20 = vmul.f32 0.5, %v504_v19 }
 0x751   :  { %v506_v21 = vsub.f32 1.5, %v505_v20 }
 0x752   :  { %v797_v22 = vpop.eup %796 }
 0x753   :  { %v507_v23 = vmul.f32 %v795_v16, %v506_v21  ;;  %v513_v24 = vmul.f32 %v797_v22, %v501_v17  ;;  %vm519_vm15 = vweird.f32 %v797_v22 }
 0x754   :  { %vm520_vm1 = vmor %vm518_vm0, %vm519_vm15 }
 0x755   :  { %v511_v26 = vsel %vm510_vm14, %v795_v16, %v507_v23  ;;  %v514_v27 = vmul.f32 %v797_v22, %v513_v24 }
 0x756   :  { %v522_v28 = vmul.f32 %v511_v26, %v488_v55 }
 0x757   :  { %v515_v29 = vmul.f32 0.5, %v514_v27 }
 0x758   :  { %v524_v34 = vmul.f32 %v522_v28, %v91_v25 }
 0x759   :  { %v516_v31 = vsub.f32 1.5, %v515_v29 }
 0x75a   :  { %v526_v33 = vadd.f32 %v524_v34, %v92_v30 }
 0x75b   :  { %v517_v32 = vmul.f32 %v797_v22, %v516_v31 }
 0x75c   :  { %753 = vmatmul.msk.f32.vlgmr.msrb.gmra.mxu2 %vm151_vm3, %v526_v33  ;;  %755 = vmatmul.msk.f32.vlgmr.msra.gmra.mxu3 %vm151_vm3, %v526_v33 }
 0x75d   :  { %v521_v36 = vsel %vm520_vm1, %v797_v22, %v517_v32  ;;  %757 = vmatmul.msk.f32.vlgmr.msra.gmra.mxu0 %vm151_vm3, %v526_v33 }
 0x75e   :  { %v523_v37 = vmul.f32 %v521_v36, %v936_v60 }
 0x760   :  { %v525_v38 = vmul.f32 %v523_v37, %v91_v25 }
 0x762   :  { %v527_v35 = vadd.f32 %v525_v38, %v92_v30 }
 0x764   :  { %754 = vmatmul.msk.f32.gmra.mxu2 %vm151_vm3, %v527_v35  ;;  %756 = vmatmul.msk.f32.gmra.mxu3 %vm151_vm3, %v527_v35 }
 0x765   :  { %758 = vmatmul.msk.f32.gmra.mxu0 %vm151_vm3, %v527_v35 }
 0x7da   :  { %v597_v10 = vpop.f32.mrf.mxu0 }
 0x7db   :  { %v683_v22 = vadd.f32 %v597_v10, %v95_v14 }
 0x7df   :  { %v551_v41 = vpop.f32.mrf.mxu2  ;;  %v574_v42 = vpop.f32.mrf.mxu3 }
 0x7e0   :  { %v603_v43 = vadd.f32 %v551_v41, %v93_v39  ;;  %v643_v44 = vadd.f32 %v574_v42, %v94_v40 }
 0x7e2   :  { %v759_v45 = vmul.f32 -1.442695, %v603_v43  ;;  %v761_v46 = vmul.f32 -1.442695, %v643_v44  ;;  %v600_v38 = vpop.f32.mrf.mxu0 }
 0x7e3   :  { %v684_v44 = vadd.f32 %v600_v38, %v95_v14 }
 0x7e4   :  { %798 = vpow2.f32 %v759_v45 }
 0x7e5   :  { %800 = vpow2.f32 %v761_v46 }
 0x7e7   :  { %v554_v51 = vpop.f32.mrf.mxu2  ;;  %v577_v52 = vpop.f32.mrf.mxu3 }
 0x7e8   :  { %v604_v53 = vadd.f32 %v554_v51, %v93_v39  ;;  %v644_v54 = vadd.f32 %v577_v52, %v94_v40 }
 0x7ea   :  { %v799_v55 = vpop.eup %798  ;;  %v760_v56 = vmul.f32 -1.442695, %v604_v53  ;;  %v762_v59 = vmul.f32 -1.442695, %v644_v54 }
 0x7eb   :  { %v801_v57 = vpop.eup %800  ;;  %v611_v58 = vadd.f32 1.0, %v799_v55 }
 0x7ec   :  { %v651_v60 = vadd.f32 1.0, %v801_v57  ;;  %802 = vpow2.f32 %v760_v56 }
 0x7ed   :  { %804 = vrcp.f32 %v611_v58  ;;  %v624_v6 = vand.u32 2147483648, %v611_v58  ;;  %v622_v9 = vand.u32 2147483647, %v611_v58  ;;  %vm618_vm4 = vweird.f32 %v611_v58 }
 0x7ee   :  { %806 = vrcp.f32 %v651_v60  ;;  %v664_v24 = vand.u32 2147483648, %v651_v60  ;;  %vm658_vm8 = vweird.f32 %v651_v60  ;;  %v662_v26 = vand.u32 2147483647, %v651_v60 }
 0x7ef   :  { %808 = vpow2.f32 %v762_v59  ;;  %v625_v16 = vor.u32 1.1754944e-38, %v624_v6  ;;  %vm623_vm6 = vcmp.eq.f32.partialorder %v622_v9, 8.507059e+37 }
 0x7f0   :  { %v665_v36 = vor.u32 1.1754944e-38, %v664_v24  ;;  %vm663_vm12 = vcmp.eq.f32.partialorder %v662_v26, 8.507059e+37 }
 0x7f2   :  { %v803_v61 = vpop.eup %802 }
 0x7f3   :  { %v805_v62 = vpop.eup %804  ;;  %v612_v63 = vadd.f32 1.0, %v803_v61 }
 0x7f4   :  { %v807_v0 = vpop.eup %806  ;;  %v614_v1 = vmul.f32 %v805_v62, %v611_v58  ;;  %vm619_vm2 = vweird.f32 %v805_v62  ;;  %v97_v58 = vld [vmem:[#allocation2 + $0x3ac] ss:$0 sm:$0xff] }
 0x7f5   :  { %v809_v2 = vpop.eup %808  ;;  %v654_v3 = vmul.f32 %v807_v0, %v651_v60  ;;  %810 = vrcp.f32 %v612_v63  ;;  %vm620_vm5 = vmor %vm618_vm4, %vm619_vm2  ;;  %vm659_vm7 = vweird.f32 %v807_v0  ;;  %v639_v27 = vand.u32 2147483648, %v612_v63 }
 0x7f6   :  { %v615_v4 = vsub.f32 1.0, %v614_v1  ;;  %v950_v5 = vadd.f32 1.0, %v809_v2  ;;  %vm954_vm9 = vmor %vm658_vm8, %vm659_vm7  ;;  %v637_v34 = vand.u32 2147483647, %v612_v63  ;;  %vm633_vm11 = vweird.f32 %v612_v63 }
 0x7f7   :  { %v655_v7 = vsub.f32 1.0, %v654_v3  ;;  %v640_v35 = vor.u32 1.1754944e-38, %v639_v27 }
 0x7f8   :  { %v616_v8 = vmul.f32 %v805_v62, %v615_v4  ;;  %812 = vrcp.f32 %v950_v5  ;;  %vm638_vm14 = vcmp.eq.f32.partialorder %v637_v34, 8.507059e+37  ;;  %v679_v45 = vand.u32 2147483648, %v950_v5 }
 0x7f9   :  { %v656_v11 = vmul.f32 %v807_v0, %v655_v7  ;;  %vm673_vm0 = vweird.f32 %v950_v5  ;;  %v677_v48 = vand.u32 2147483647, %v950_v5 }
 0x7fa   :  { %v617_v12 = vadd.f32 %v805_v62, %v616_v8  ;;  %v680_v53 = vor.u32 1.1754944e-38, %v679_v45 }
 0x7fb   :  { %v811_v13 = vpop.eup %810  ;;  %v657_v20 = vadd.f32 %v807_v0, %v656_v11  ;;  %vm678_vm2 = vcmp.eq.f32.partialorder %v677_v48, 8.507059e+37 }
 0x7fc   :  { %v621_v17 = vsel %vm620_vm5, %v805_v62, %v617_v12  ;;  %v629_v18 = vmul.f32 %v811_v13, %v612_v63  ;;  %vm634_vm10 = vweird.f32 %v811_v13 }
 0x7fd   :  { %v626_v19 = vsel %vm623_vm6, %v625_v16, %v621_v17  ;;  %v661_v32 = vsel %vm954_vm9, %v807_v0, %v657_v20  ;;  %vm635_vm13 = vmor %vm633_vm11, %vm634_vm10 }
 0x7fe   :  { %v813_v21 = vpop.eup %812  ;;  %v685_v23 = vmul.f32 %v626_v19, %v96_v15  ;;  %v630_v25 = vsub.f32 1.0, %v629_v18  ;;  %v666_v40 = vsel %vm663_vm12, %v665_v36, %v661_v32 }
 0x7ff   :  { %v669_v28 = vmul.f32 %v813_v21, %v950_v5  ;;  %vm674_vm15 = vweird.f32 %v813_v21  ;;  %v691_v47 = vsub.f32 1.0, %v666_v40 }
 0x800   :  { %v631_v30 = vmul.f32 %v811_v13, %v630_v25  ;;  %v687_v31 = vadd.f32 %v685_v23, %v683_v22  ;;  %vm675_vm1 = vmor %vm673_vm0, %vm674_vm15 }
 0x801   :  { %v670_v33 = vsub.f32 1.0, %v669_v28 }
 0x802   :  { %v632_v37 = vadd.f32 %v811_v13, %v631_v30  ;;  %814 = vtanh.f32 %v687_v31 }
 0x803   :  { %v671_v39 = vmul.f32 %v813_v21, %v670_v33 }
 0x804   :  { %v636_v41 = vsel %vm635_vm13, %v811_v13, %v632_v37 }
 0x805   :  { %v641_v42 = vsel %vm638_vm14, %v640_v35, %v636_v41  ;;  %v672_v43 = vadd.f32 %v813_v21, %v671_v39 }
 0x806   :  { %v686_v46 = vmul.f32 %v641_v42, %v96_v15 }
 0x807   :  { %v676_v52 = vsel %vm675_vm1, %v813_v21, %v672_v43 }
 0x808   :  { %v815_v49 = vpop.eup %814  ;;  %v688_v50 = vadd.f32 %v686_v46, %v684_v44  ;;  %v681_v54 = vsel %vm678_vm2, %v680_v53, %v676_v52 }
 0x809   :  { %v693_v51 = vmul.f32 %v815_v49, %v691_v47  ;;  %v692_v55 = vsub.f32 1.0, %v681_v54 }
 0x80a   :  { %816 = vtanh.f32 %v688_v50 }
 0x80b   :  { %763 = vmatmul.msk.f32.vlgmr.msrb.gmra.mxu1 %vm151_vm3, %v693_v51 }
 0x810   :  { %v817_v56 = vpop.eup %816 }
 0x811   :  { %v694_v57 = vmul.f32 %v817_v56, %v692_v55 }
 0x813   :  { %764 = vmatmul.msk.f32.gmra.mxu1 %vm151_vm3, %v694_v57 }
 0x888   :  { %v718_v59 = vpop.f32.mrf.mxu1 }
 0x889   :  { %v719_v60 = vadd.f32 %v718_v59, %v97_v58 }
 0x88b   :  { %724 = vst [vmem:[%s974_s3] sm:$0xff] %v719_v60 }
 0x890   :  { %v721_v61 = vpop.f32.mrf.mxu1 }
 0x891   :  { %v722_v62 = vadd.f32 %v721_v61, %v97_v58 }
 0x893   :  { %725 = vst [vmem:[%s974_s3 + $0x8] sm:$0xff] %v722_v62 }
 0x894   :  { %730 = vsyncpa [#allocation3], 1 }

</bundles_post_ra>
